<compile_context>
chip_gen: v5e
topology: v5e:2x2
jax: 0.10.0
libtpu: 0.0.40
codegen_flags: <defaults>
</compile_context>

<pallas_src>
import jax
import jax.numpy as jnp
import numpy as np
from jax.experimental import pallas as pl
from jax.experimental.pallas import tpu as pltpu


def attention_kernel(state_ref, context_ref, ww_ref, bw_ref, wu_ref, bu_ref,
                     wv_ref, bv_ref, out_ref, att_ref):
    B, S, Ds = state_ref.shape
    _, C, Dc_pad = context_ref.shape
    H = ww_ref.shape[1]

    # --- Fused projections over the WHOLE batch (one MXU matmul each) ---
    state2d = state_ref[...].reshape(B * S, Ds)            # (B*S, Ds)
    ctx = context_ref[...]                                 # (B, C, Dc_pad)
    ctx2d = ctx.reshape(B * C, Dc_pad)                     # (B*C, Dc_pad)

    v_state = jnp.dot(state2d, ww_ref[...],
                      preferred_element_type=jnp.float32) + bw_ref[...]    # (B*S, H)
    v_context = jnp.dot(ctx2d, wu_ref[...],
                        preferred_element_type=jnp.float32) + bu_ref[...]  # (B*C, H)

    # --- additive attention scores: net_v(tanh(W s + U c)) for every (b,s,c) ---
    # (the per-s Python loop in the PyTorch code is vectorized via broadcast)
    t = jnp.tanh(v_state.reshape(B, S, 1, H) +
                 v_context.reshape(B, 1, C, H))                            # (B,S,C,H)
    scores = jnp.sum(t * wv_ref[...].reshape(1, 1, 1, H), axis=-1)         # (B,S,C)
    # net_v bias: scalar from SMEM (softmax-shift no-op, kept for exact parity)
    scores = scores + bv_ref[0, 0]

    # --- softmax over the context axis (nn.Softmax(dim=1) on (B,C,1)) ---
    m = jnp.max(scores, axis=-1, keepdims=True)
    e = jnp.exp(scores - m)
    inv_l = pl.reciprocal(jnp.sum(e, axis=-1, keepdims=True))              # exact
    att = e * inv_l                                                        # (B,S,C)

    # --- attention-weighted context: batched MXU matmul, lane-dense output ---
    out = jnp.einsum('bsc,bcd->bsd', att, ctx,
                     preferred_element_type=jnp.float32)                   # (B,S,Dc_pad)

    out_ref[...] = out.astype(out_ref.dtype)
    att_ref[...] = att.astype(att_ref.dtype)


def attention_forward(context, state, params):
    """Matches AttentionModel.forward(context, state) -> (output_context, att_weight)."""
    ww, bw, wu, bu, wv, bv = params
    B, S, Ds = state.shape
    _B, C, Dc = context.shape
    assert B == _B
    H = ww.shape[1]

    # Zero-pad context features (and the matching net_U weight rows) to a full
    # 128-lane width: identical math (zero rows contribute nothing), but the
    # att@context matmul result and its store become lane-dense.
    DC_PAD = ((Dc + 127) // 128) * 128
    ctx_pad = jnp.pad(context, ((0, 0), (0, 0), (0, DC_PAD - Dc)))
    wu_pad = jnp.pad(wu, ((0, DC_PAD - Dc), (0, 0)))

    out_pad, att = pl.pallas_call(
        attention_kernel,
        out_shape=(
            jax.ShapeDtypeStruct((B, S, DC_PAD), jnp.float32),  # output_context (padded)
            jax.ShapeDtypeStruct((B, S, C), jnp.float32),       # att_weight
        ),
        grid=(1,),  # single invocation: whole batch in one step (working set is a few KiB)
        in_specs=[
            pl.BlockSpec((B, S, Ds), lambda i: (0, 0, 0)),       # state
            pl.BlockSpec((B, C, DC_PAD), lambda i: (0, 0, 0)),   # context (padded)
            pl.BlockSpec((Ds, H), lambda i: (0, 0)),             # W_w
            pl.BlockSpec((1, H), lambda i: (0, 0)),              # b_w
            pl.BlockSpec((DC_PAD, H), lambda i: (0, 0)),         # W_u (padded rows)
            pl.BlockSpec((1, H), lambda i: (0, 0)),              # b_u
            pl.BlockSpec((1, H), lambda i: (0, 0)),              # w_v
            pl.BlockSpec(memory_space=pltpu.MemorySpace.SMEM),   # b_v scalar in SMEM
        ],
        out_specs=(
            pl.BlockSpec((B, S, DC_PAD), lambda i: (0, 0, 0)),
            pl.BlockSpec((B, S, C), lambda i: (0, 0, 0)),
        ),
        compiler_params=pltpu.CompilerParams(
            dimension_semantics=("arbitrary",)),
    )(state, ctx_pad, ww, bw, wu_pad, bu, wv, bv)

    return out_pad[..., :Dc], att


def attention_reference(context, state, params):
    """Pure-JAX reference mirroring the PyTorch forward exactly."""
    ww, bw, wu, bu, wv, bv = params
    v_state = state @ ww + bw                                       # (B, S, H)
    v_context = context @ wu + bu                                   # (B, C, H)
    t = jnp.tanh(v_state[:, :, None, :] + v_context[:, None, :, :]) # (B, S, C, H)
    scores = jnp.einsum('bsch,h->bsc', t, wv[0]) + bv[0, 0]         # (B, S, C)
    att = jax.nn.softmax(scores, axis=-1)
    out = jnp.einsum('bsc,bcd->bsd', att, context)                  # (B, S, Dc)
    return out, att


if __name__ == "__main__":
    # small shapes implied by the forward: batch=2, state_length=8,
    # context_length=6, state_size=16, context_size=12, hidden_size=32
    B, S, C = 2, 8, 6
    Ds, Dc, H = 16, 12, 32

    key = jax.random.PRNGKey(0)
    ks = jax.random.split(key, 8)

    def uinit(k, shape, fan_in):
        bound = 1.0 / np.sqrt(fan_in)
        return jax.random.uniform(k, shape, jnp.float32, -bound, bound)

    # nn.Linear weights, pre-transposed to (in, out); biases as (1, out)
    ww = uinit(ks[0], (Ds, H), Ds)   # net_W.weight.T
    bw = uinit(ks[1], (1, H), Ds)    # net_W.bias
    wu = uinit(ks[2], (Dc, H), Dc)   # net_U.weight.T
    bu = uinit(ks[3], (1, H), Dc)    # net_U.bias
    wv = uinit(ks[4], (1, H), H)     # net_v.weight
    bv = uinit(ks[5], (1, 1), H)     # net_v.bias
    params = (ww, bw, wu, bu, wv, bv)

    context = jax.random.normal(ks[6], (B, C, Dc), jnp.float32)
    state = jax.random.normal(ks[7], (B, S, Ds), jnp.float32)

    out_ctx, att_w = attention_forward(context, state, params)
    out_ctx = jax.block_until_ready(out_ctx)
    att_w = jax.block_until_ready(att_w)

    ref_out, ref_att = attention_reference(context, state, params)
    np.testing.assert_allclose(np.asarray(out_ctx), np.asarray(ref_out),
                               rtol=1e-5, atol=1e-5)
    np.testing.assert_allclose(np.asarray(att_w), np.asarray(ref_att),
                               rtol=1e-5, atol=1e-5)
    assert out_ctx.shape == (B, S, Dc) and att_w.shape == (B, S, C)

    print("KERNEL_OK")
</pallas_src>

<mosaic_0001>
module attributes {stable_mosaic.version = 11 : i64} {
  func.func @attention_kernel(%arg0: i32, %arg1: memref<2x8x16xf32, #tpu.memory_space<vmem>>, %arg2: memref<2x6x128xf32, #tpu.memory_space<vmem>>, %arg3: memref<16x32xf32, #tpu.memory_space<vmem>>, %arg4: memref<1x32xf32, #tpu.memory_space<vmem>>, %arg5: memref<128x32xf32, #tpu.memory_space<vmem>>, %arg6: memref<1x32xf32, #tpu.memory_space<vmem>>, %arg7: memref<1x32xf32, #tpu.memory_space<vmem>>, %arg8: memref<1x1xf32, #tpu.memory_space<smem>>, %arg9: memref<2x8x128xf32, #tpu.memory_space<vmem>>, %arg10: memref<2x8x6xf32, #tpu.memory_space<vmem>>) attributes {dimension_semantics = [#tpu.dimension_semantics<arbitrary>], iteration_bounds = array<i64: 1>, scalar_prefetch = 0 : i64, scratch_operands = 0 : i64, tpu.core_type = #tpu.core_type<tc>, window_params = [{pipeline_mode = #tpu.pipeline_mode<synchronous>, transform_indices = @transform_0, window_bounds = array<i64: 2, 8, 16>}, {pipeline_mode = #tpu.pipeline_mode<synchronous>, transform_indices = @transform_1, window_bounds = array<i64: 2, 6, 128>}, {pipeline_mode = #tpu.pipeline_mode<synchronous>, transform_indices = @transform_2, window_bounds = array<i64: 16, 32>}, {pipeline_mode = #tpu.pipeline_mode<synchronous>, transform_indices = @transform_3, window_bounds = array<i64: 1, 32>}, {pipeline_mode = #tpu.pipeline_mode<synchronous>, transform_indices = @transform_4, window_bounds = array<i64: 128, 32>}, {pipeline_mode = #tpu.pipeline_mode<synchronous>, transform_indices = @transform_5, window_bounds = array<i64: 1, 32>}, {pipeline_mode = #tpu.pipeline_mode<synchronous>, transform_indices = @transform_6, window_bounds = array<i64: 1, 32>}, {transform_indices = @transform_7, window_bounds = array<i64: 1, 1>}, {pipeline_mode = #tpu.pipeline_mode<synchronous>, transform_indices = @transform_8, window_bounds = array<i64: 2, 8, 128>}, {pipeline_mode = #tpu.pipeline_mode<synchronous>, transform_indices = @transform_9, window_bounds = array<i64: 2, 8, 6>}]} {
    %c0 = arith.constant 0 : index
    %c0_0 = arith.constant 0 : index
    %c0_1 = arith.constant 0 : index
    %0 = vector.load %arg1[%c0, %c0_0, %c0_1] : memref<2x8x16xf32, #tpu.memory_space<vmem>>, vector<2x8x16xf32>
    %1 = vector.shape_cast %0 : vector<2x8x16xf32> to vector<16x16xf32>
    %c0_2 = arith.constant 0 : index
    %c0_3 = arith.constant 0 : index
    %c0_4 = arith.constant 0 : index
    %2 = vector.load %arg2[%c0_2, %c0_3, %c0_4] : memref<2x6x128xf32, #tpu.memory_space<vmem>>, vector<2x6x128xf32>
    %3 = vector.shape_cast %2 : vector<2x6x128xf32> to vector<12x128xf32>
    %c0_5 = arith.constant 0 : index
    %c0_6 = arith.constant 0 : index
    %4 = vector.load %arg3[%c0_5, %c0_6] : memref<16x32xf32, #tpu.memory_space<vmem>>, vector<16x32xf32>
    %cst = arith.constant dense<0.000000e+00> : vector<16x32xf32>
    %5 = tpu.matmul %1, %4, %cst {dimension_numbers = #tpu.dot_dimension_numbers<[1], [0], [0], [1], [0, 0, 1, 1], [], []>} : vector<16x16xf32>, vector<16x32xf32>, vector<16x32xf32> -> vector<16x32xf32>
    %c0_7 = arith.constant 0 : index
    %c0_8 = arith.constant 0 : index
    %6 = vector.load %arg4[%c0_7, %c0_8] : memref<1x32xf32, #tpu.memory_space<vmem>>, vector<1x32xf32>
    %7 = vector.broadcast %6 : vector<1x32xf32> to vector<16x32xf32>
    %8 = arith.addf %5, %7 : vector<16x32xf32>
    %c0_9 = arith.constant 0 : index
    %c0_10 = arith.constant 0 : index
    %9 = vector.load %arg5[%c0_9, %c0_10] : memref<128x32xf32, #tpu.memory_space<vmem>>, vector<128x32xf32>
    %cst_11 = arith.constant dense<0.000000e+00> : vector<12x32xf32>
    %10 = tpu.matmul %3, %9, %cst_11 {dimension_numbers = #tpu.dot_dimension_numbers<[1], [0], [0], [1], [0, 0, 1, 1], [], []>} : vector<12x128xf32>, vector<128x32xf32>, vector<12x32xf32> -> vector<12x32xf32>
    %c0_12 = arith.constant 0 : index
    %c0_13 = arith.constant 0 : index
    %11 = vector.load %arg6[%c0_12, %c0_13] : memref<1x32xf32, #tpu.memory_space<vmem>>, vector<1x32xf32>
    %12 = vector.broadcast %11 : vector<1x32xf32> to vector<12x32xf32>
    %13 = arith.addf %10, %12 : vector<12x32xf32>
    %14 = vector.shape_cast %8 : vector<16x32xf32> to vector<2x8x1x32xf32>
    %15 = vector.shape_cast %13 : vector<12x32xf32> to vector<2x1x6x32xf32>
    %16 = vector.broadcast %14 : vector<2x8x1x32xf32> to vector<2x8x6x32xf32>
    %17 = vector.broadcast %15 : vector<2x1x6x32xf32> to vector<2x8x6x32xf32>
    %18 = arith.addf %16, %17 : vector<2x8x6x32xf32>
    %19 = math.tanh %18 : vector<2x8x6x32xf32>
    %c0_14 = arith.constant 0 : index
    %c0_15 = arith.constant 0 : index
    %20 = vector.load %arg7[%c0_14, %c0_15] : memref<1x32xf32, #tpu.memory_space<vmem>>, vector<1x32xf32>
    %21 = vector.shape_cast %20 : vector<1x32xf32> to vector<1x1x1x32xf32>
    %22 = vector.broadcast %21 : vector<1x1x1x32xf32> to vector<2x8x6x32xf32>
    %23 = arith.mulf %19, %22 : vector<2x8x6x32xf32>
    %cst_16 = arith.constant dense<0.000000e+00> : vector<2x8x6xf32>
    %24 = vector.multi_reduction <add>, %23, %cst_16 [3] : vector<2x8x6x32xf32> to vector<2x8x6xf32>
    %c0_17 = arith.constant 0 : index
    %c0_18 = arith.constant 0 : index
    %25 = memref.load %arg8[%c0_17, %c0_18] : memref<1x1xf32, #tpu.memory_space<smem>>
    %26 = vector.broadcast %25 : f32 to vector<2x8x6xf32>
    %27 = arith.addf %24, %26 : vector<2x8x6xf32>
    %cst_19 = arith.constant dense<0xFF800000> : vector<2x8xf32>
    %28 = vector.multi_reduction <maximumf>, %27, %cst_19 [2] : vector<2x8x6xf32> to vector<2x8xf32>
    %29 = vector.shape_cast %28 : vector<2x8xf32> to vector<2x8x1xf32>
    %30 = vector.broadcast %29 : vector<2x8x1xf32> to vector<2x8x6xf32>
    %31 = arith.subf %27, %30 : vector<2x8x6xf32>
    %32 = math.exp %31 : vector<2x8x6xf32>
    %cst_20 = arith.constant dense<0.000000e+00> : vector<2x8xf32>
    %33 = vector.multi_reduction <add>, %32, %cst_20 [2] : vector<2x8x6xf32> to vector<2x8xf32>
    %34 = vector.shape_cast %33 : vector<2x8xf32> to vector<2x8x1xf32>
    %35 = tpu.reciprocal %34 : vector<2x8x1xf32> -> vector<2x8x1xf32>
    %36 = vector.broadcast %35 : vector<2x8x1xf32> to vector<2x8x6xf32>
    %37 = arith.mulf %32, %36 : vector<2x8x6xf32>
    "tpu.trace_start"() <{level = 10 : i32, message = "bsc,bcd->bsd"}> : () -> ()
    %cst_21 = arith.constant dense<0.000000e+00> : vector<2x8x128xf32>
    %38 = tpu.matmul %37, %2, %cst_21 {dimension_numbers = #tpu.dot_dimension_numbers<[2], [1], [1], [2], [0, 0, 0, 1, 1, 2], [0], [0]>} : vector<2x8x6xf32>, vector<2x6x128xf32>, vector<2x8x128xf32> -> vector<2x8x128xf32>
    "tpu.trace_stop"() : () -> ()
    %c0_22 = arith.constant 0 : index
    %c0_23 = arith.constant 0 : index
    %c0_24 = arith.constant 0 : index
    %39 = vector.load %arg9[%c0_22, %c0_23, %c0_24] : memref<2x8x128xf32, #tpu.memory_space<vmem>>, vector<2x8x128xf32>
    tpu.vector_store %arg9[%c0_22, %c0_23, %c0_24], %38 {strides = array<i32>} : memref<2x8x128xf32, #tpu.memory_space<vmem>>, vector<2x8x128xf32>,
    %c0_25 = arith.constant 0 : index
    %c0_26 = arith.constant 0 : index
    %c0_27 = arith.constant 0 : index
    %40 = vector.load %arg10[%c0_25, %c0_26, %c0_27] : memref<2x8x6xf32, #tpu.memory_space<vmem>>, vector<2x8x6xf32>
    tpu.vector_store %arg10[%c0_25, %c0_26, %c0_27], %37 {strides = array<i32>} : memref<2x8x6xf32, #tpu.memory_space<vmem>>, vector<2x8x6xf32>,
    return
  }
  func.func @transform_0(%arg0: i32) -> (i32, i32, i32) {
    %c0_i32 = arith.constant 0 : i32
    %c0_i32_0 = arith.constant 0 : i32
    %c0_i32_1 = arith.constant 0 : i32
    %c0_i32_2 = arith.constant 0 : i32
    return %c0_i32, %c0_i32_0, %c0_i32_1 : i32, i32, i32
  }
  func.func @transform_1(%arg0: i32) -> (i32, i32, i32) {
    %c0_i32 = arith.constant 0 : i32
    %c0_i32_0 = arith.constant 0 : i32
    %c0_i32_1 = arith.constant 0 : i32
    %c0_i32_2 = arith.constant 0 : i32
    return %c0_i32, %c0_i32_0, %c0_i32_1 : i32, i32, i32
  }
  func.func @transform_2(%arg0: i32) -> (i32, i32) {
    %c0_i32 = arith.constant 0 : i32
    %c0_i32_0 = arith.constant 0 : i32
    %c0_i32_1 = arith.constant 0 : i32
    return %c0_i32, %c0_i32_0 : i32, i32
  }
  func.func @transform_3(%arg0: i32) -> (i32, i32) {
    %c0_i32 = arith.constant 0 : i32
    %c0_i32_0 = arith.constant 0 : i32
    %c0_i32_1 = arith.constant 0 : i32
    return %c0_i32, %c0_i32_0 : i32, i32
  }
  func.func @transform_4(%arg0: i32) -> (i32, i32) {
    %c0_i32 = arith.constant 0 : i32
    %c0_i32_0 = arith.constant 0 : i32
    %c0_i32_1 = arith.constant 0 : i32
    return %c0_i32, %c0_i32_0 : i32, i32
  }
  func.func @transform_5(%arg0: i32) -> (i32, i32) {
    %c0_i32 = arith.constant 0 : i32
    %c0_i32_0 = arith.constant 0 : i32
    %c0_i32_1 = arith.constant 0 : i32
    return %c0_i32, %c0_i32_0 : i32, i32
  }
  func.func @transform_6(%arg0: i32) -> (i32, i32) {
    %c0_i32 = arith.constant 0 : i32
    %c0_i32_0 = arith.constant 0 : i32
    %c0_i32_1 = arith.constant 0 : i32
    return %c0_i32, %c0_i32_0 : i32, i32
  }
  func.func @transform_7(%arg0: i32) -> (i32, i32) {
    %c0_i32 = arith.constant 0 : i32
    %c0_i32_0 = arith.constant 0 : i32
    %c0_i32_1 = arith.constant 0 : i32
    return %c0_i32, %c0_i32_0 : i32, i32
  }
  func.func @transform_8(%arg0: i32) -> (i32, i32, i32) {
    %c0_i32 = arith.constant 0 : i32
    %c0_i32_0 = arith.constant 0 : i32
    %c0_i32_1 = arith.constant 0 : i32
    %c0_i32_2 = arith.constant 0 : i32
    return %c0_i32, %c0_i32_0, %c0_i32_1 : i32, i32, i32
  }
  func.func @transform_9(%arg0: i32) -> (i32, i32, i32) {
    %c0_i32 = arith.constant 0 : i32
    %c0_i32_0 = arith.constant 0 : i32
    %c0_i32_1 = arith.constant 0 : i32
    %c0_i32_2 = arith.constant 0 : i32
    return %c0_i32, %c0_i32_0, %c0_i32_1 : i32, i32, i32
  }
}

</mosaic_0001>

<bundles_post_ra>
// kernel: tpu_custom_call.1
= control target key start
LH: loop header
LB: loop body
LE: loop exit
PB: predicated region body
PF: predicated region fallthrough
CT: control target
= control target key end

     0   :  { %vm49_vm0 = vcmask 130048   ;;  %s1526_s0 = inlined_call_operand.vmem [shape: f32[2,8,16], index: 0, kind: input, shape index: {}]   ;;  %s1527_s1 = inlined_call_operand.vmem [shape: f32[2,6,128], index: 1, kind: input, shape index: {}]   ;;  %s1528_s2 = inlined_call_operand.vmem [shape: f32[16,32], index: 2, kind: input, shape index: {}]   ;;  %s1529_s3 = inlined_call_operand.vmem [shape: f32[1,32], index: 3, kind: input, shape index: {}]   ;;  %s1530_s4 = inlined_call_operand.vmem [shape: f32[128,32], index: 4, kind: input, shape index: {}]   ;;  %s1531_s5 = inlined_call_operand.vmem [shape: f32[1,32], index: 5, kind: input, shape index: {}]   ;;  %s1532_s6 = inlined_call_operand.vmem [shape: f32[1,32], index: 6, kind: input, shape index: {}]   ;;  %s1533_s7 = inlined_call_operand.<no memory space> [shape: f32[1,1], index: 7, kind: input, shape index: {}]   ;;  %s1534_s8 = inlined_call_operand.hbm [shape: f32[2,8,128], index: 8, kind: output, shape index: {0}]   ;;  %s1535_s9 = inlined_call_operand.vmem [shape: f32[2,8,6], index: 9, kind: output, shape index: {1}]  }
   0x1   :  { %v94_v0 = vld [vmem:[%s1530_s4 + $0x78] sm:$0xff]  ;;  %v93_v1 = vld [vmem:[%s1530_s4 + $0x70] sm:$0xff]  ;;  %v92_v2 = vld [vmem:[%s1530_s4 + $0x68] sm:$0xff] }
   0x2   :  { %114 = vmatpush.msra.mxu1 %v94_v0  ;;  %v91_v3 = vld [vmem:[%s1530_s4 + $0x60] sm:$0xff]  ;;  %v90_v4 = vld [vmem:[%s1530_s4 + $0x58] sm:$0xff]  ;;  %v1079_v6 = vld [vmem:[%s1527_s1 + $0x8] sm:$0x3f] }
   0x3   :  { %v1074_v5 = vld [vmem:[%s1527_s1] sm:$0x3f]  ;;  %v44_v9 = vld [vmem:[%s1528_s2 + $0x8] sm:$0xff]  ;;  %105 = vst [vmem:[#allocation1 + $0x3] ss:$4 sm:$0xff] %v1079_v6  ;;  %v41_v12 = vrot.slane %v1079_v6, 2 }
   0x4   :  { %115 = vmatpush.msra.mxu1 %v93_v1  ;;  %v39_v7 = vrot.slane %v1074_v5, 2  ;;  %v40_v8 = vrot.slane %v1074_v5, 4  ;;  %99 = vst [vmem:[#allocation1] ss:$4 sm:$0xff] %v1074_v5  ;;  %v43_v10 = vld [vmem:[%s1528_s2] sm:$0xff]  ;;  %70 = vmatpush.msra.mxu0 %v44_v9  ;;  %v42_v13 = vrot.slane %v1079_v6, 4 }
   0x5   :  { %v33_v11 = vld [vmem:[%s1526_s0] sm:$0xff]  ;;  %v89_v14 = vld [vmem:[%s1530_s4 + $0x50] sm:$0xff]  ;;  %v88_v15 = vld [vmem:[%s1530_s4 + $0x48] sm:$0xff]  ;;  %107 = vst [vmem:[#allocation1 + $0x20] ss:$4 sm:$0xff] %v41_v12 }
   0x6   :  { %116 = vmatpush.msra.mxu1 %v92_v2  ;;  %101 = vst [vmem:[#allocation1 + $0x1] ss:$4 sm:$0xff] %v39_v7  ;;  %71 = vmatpush.msra.mxu0 %v43_v10 }
   0x7   :  { %103 = vst [vmem:[#allocation1 + $0x2] ss:$4 sm:$0xff] %v40_v8  ;;  %892 = vmatmul.msk.f32.vlgmr.msra.gmra.mxu0 %vm49_vm0, %v33_v11 }
   0x8   :  { %117 = vmatpush.msra.mxu1 %v91_v3 }
   0xa   :  { %118 = vmatpush.msra.mxu1 %v90_v4 }
   0xb   :  { %16 = vsyncpa [#allocation4], 0  ;;  %109 = vst [vmem:[#allocation1 + $0x21] ss:$4 sm:$0xff] %v42_v13  ;;  %v87_v16 = vld [vmem:[%s1530_s4 + $0x40] sm:$0xff]  ;;  %v86_v17 = vld [vmem:[%s1530_s4 + $0x38] sm:$0xff] }
   0xc   :  { %119 = vmatpush.msra.mxu1 %v89_v14  ;;  %v34_v18 = vld [vmem:[%s1526_s0 + $0x8] sm:$0xff]  ;;  %v85_v19 = vld [vmem:[%s1530_s4 + $0x30] sm:$0xff]  ;;  %v83_v21 = vld [vmem:[%s1530_s4 + $0x20] sm:$0xff]  ;;  %vm328_vm1 = vcmask 259072   ;;  %vm429_vm2 = vcmask 1041409   ;;  %vm431_vm3 = vcmask 1042434  }
   0xd   :  { %v84_v20 = vld [vmem:[%s1530_s4 + $0x28] sm:$0xff]  ;;  %v82_v22 = vld [vmem:[%s1530_s4 + $0x18] sm:$0xff]  ;;  %v81_v23 = vld [vmem:[%s1530_s4 + $0x10] sm:$0xff]  ;;  %vm433_vm4 = vcmask 1043459   ;;  %vm435_vm5 = vcmask 1044484   ;;  %vm437_vm6 = vcmask 1045509  }
   0xe   :  { %120 = vmatpush.msra.mxu1 %v88_v15  ;;  %v80_v24 = vld [vmem:[%s1530_s4 + $0x8] sm:$0xff]  ;;  %v79_v25 = vld [vmem:[%s1530_s4] sm:$0xff]  ;;  %vm439_vm7 = vcmask 1046534   ;;  %vm441_vm8 = vcmask 1047559   ;;  %vm452_vm9 = vcmask 48128   ;;  %s1003_s13 = smov [#allocation3]  }
   0xf   :  { %893 = vmatmul.msk.f32.gmra.mxu0 %vm49_vm0, %v34_v18  ;;  %v110_v26 = vld.sshfl [vmem:[#allocation1] sm:$0xff pattern:$0x73625140]  ;;  %s874_s14 = sshll.u32 %s1003_s13, 4  ;;  %s876_s17 = sshll.u32 %s1534_s8, 4  ;;  %s875_s14 = int_to_ptr.vmem [resolvable:$true] %s874_s14  ;;  %s877_s17 = int_to_ptr.hbm [resolvable:$true] %s876_s17 }
  0x10   :  { %121 = vmatpush.msra.mxu1 %v87_v16  ;;  %v1137_v28 = vld [vmem:[%s1531_s5] ss:$0 sm:$0xff]  ;;  %s1004_s18 = smov 128   ;;  %s1005_s19 = smov 8  }
  0x11   :  { %v1142_v30 = vld [vmem:[%s1529_s3] ss:$0 sm:$0xff] }
  0x12   :  { %122 = vmatpush.msra.mxu1 %v86_v17  ;;  %v111_v27 = vld.sshfl [vmem:[#allocation1 + $0x20] sm:$0xff pattern:$0x73625140] }
  0x13   :  { %v1174_v44 = vld [vmem:[%s1532_s6] ss:$0 sm:$0xff] }
  0x14   :  { %123 = vmatpush.msra.mxu1 %v85_v19 }
  0x16   :  { %124 = vmatpush.msra.mxu1 %v84_v20 }
  0x18   :  { %125 = vmatpush.msra.mxu1 %v83_v21 }
  0x1a   :  { %126 = vmatpush.msra.mxu1 %v82_v22 }
  0x1c   :  { %127 = vmatpush.msra.mxu1 %v81_v23 }
  0x1e   :  { %128 = vmatpush.msra.mxu1 %v80_v24 }
  0x20   :  { %129 = vmatpush.msra.mxu1 %v79_v25 }
  0x21   :  { %130 = vmatmul.f32.vlgmr.msra.gmra.mxu1 %v110_v26 }
  0x29   :  { %133 = vmatmul.f32.gmra.mxu1 %v111_v27 }
  0x84   :  { %v73_v32 = vpop.f32.mrf.mxu0 }
  0x85   :  { %v1156_v35 = vadd.f32 %v1142_v30, %v73_v32 }
  0x87   :  { %v139_v36 = vrot.slane %v1156_v35, 1  ;;  %v159_v37 = vperm.slane %v1156_v35, 0  ;;  %v140_v42 = vrot.slane %v1156_v35, 2  ;;  %v141_v45 = vrot.slane %v1156_v35, 3 }
  0x88   :  { %v142_v55 = vrot.slane %v1156_v35, 4  ;;  %v143_v58 = vrot.slane %v1156_v35, 5  ;;  %v144_v8 = vrot.slane %v1156_v35, 6 }
  0x89   :  { %v160_v38 = vperm.slane %v139_v36, 0  ;;  %v161_v46 = vperm.slane %v140_v42, 0  ;;  %v162_v50 = vperm.slane %v141_v45, 0 }
  0x8a   :  { %v163_v59 = vperm.slane %v142_v55, 0  ;;  %v164_v0 = vperm.slane %v143_v58, 0  ;;  %v165_v12 = vperm.slane %v144_v8, 0 }
  0x8c   :  { %v76_v16 = vpop.f32.mrf.mxu0 }
  0x8d   :  { %v1213_v22 = vadd.f32 %v1142_v30, %v76_v16 }
  0x8f   :  { %v146_v27 = vrot.slane %v1213_v22, 1  ;;  %v152_v8 = vrot.slane %v1213_v22, 7 }
  0x91   :  { %v168_v32 = vperm.slane %v146_v27, 0 }
  0x9e   :  { %v131_v29 = vpop.f32.mrf.mxu1 }
  0x9f   :  { %v1145_v31 = vadd.f32 %v1137_v28, %v131_v29 }
  0xa1   :  { %v1148_v33 = vrot.slane %v1145_v31, 2  ;;  %v1151_v34 = vrot.slane %v1145_v31, 4  ;;  %191 = vst [vmem:[#allocation1] ss:$4 sm:$0xff] %v1145_v31  ;;  %v1207_v17 = vrot.slane %v1145_v31, 6 }
  0xa2   :  { %198 = vst [vmem:[#allocation1 + $0x20] ss:$4 sm:$0xff] %v1145_v31 }
  0xa3   :  { %193 = vst [vmem:[#allocation1 + $0x1] ss:$4 sm:$0xff] %v1148_v33 }
  0xa4   :  { %195 = vst [vmem:[#allocation1 + $0x2] ss:$4 sm:$0xff] %v1151_v34 }
  0xa5   :  { %200 = vst [vmem:[#allocation1 + $0x21] ss:$4 sm:$0xff] %v1148_v33 }
  0xa6   :  { %202 = vst [vmem:[#allocation1 + $0x22] ss:$4 sm:$0xff] %v1151_v34  ;;  %v134_v3 = vpop.f32.mrf.mxu1 }
  0xa7   :  { %v1199_v11 = vadd.f32 %v1137_v28, %v134_v3  ;;  %v167_v28 = vperm.slane %v1213_v22, 0  ;;  %v151_v3 = vrot.slane %v1213_v22, 6 }
  0xa9   :  { %v1204_v15 = vrot.slane %v1199_v11, 2 }
  0xab   :  { %v196_v39 = vld.sshfl [vmem:[#allocation1] sm:$0xff pattern:$0x73625140] }
  0xac   :  { %204 = vst [vmem:[#allocation1] ss:$4 sm:$0xff] %v1145_v31  ;;  %v276_v40 = vadd.f32 %v196_v39, %v159_v37  ;;  %v147_v37 = vrot.slane %v1213_v22, 2  ;;  %v148_v39 = vrot.slane %v1213_v22, 3 }
  0xad   :  { %v203_v41 = vld.sshfl [vmem:[#allocation1 + $0x20] sm:$0xff pattern:$0x73625140]  ;;  %205 = vst [vmem:[#allocation1 + $0x1] ss:$4 sm:$0xff] %v1148_v33 }
  0xae   :  { %206 = vst [vmem:[#allocation1 + $0x2] ss:$4 sm:$0xff] %v1151_v34  ;;  %908 = vtanh.f32 %v276_v40  ;;  %v277_v43 = vadd.f32 %v203_v41, %v160_v38  ;;  %v169_v40 = vperm.slane %v147_v37, 0  ;;  %v170_v45 = vperm.slane %v148_v39, 0 }
  0xaf   :  { %208 = vst [vmem:[#allocation1 + $0x20] ss:$4 sm:$0xff] %v1145_v31  ;;  %v411_v39 = vlaneseq }
  0xb0   :  { %209 = vst [vmem:[#allocation1 + $0x21] ss:$4 sm:$0xff] %v1148_v33  ;;  %910 = vtanh.f32 %v277_v43 }
  0xb1   :  { %210 = vst [vmem:[#allocation1 + $0x22] ss:$4 sm:$0xff] %v1151_v34 }
  0xb4   :  { %v909_v47 = vpop.eup %908 }
  0xb5   :  { %v207_v48 = vld.sshfl [vmem:[#allocation1] sm:$0xff pattern:$0x73625140]  ;;  %v312_v49 = vmul.f32 %v909_v47, %v1174_v44 }
  0xb6   :  { %212 = vst [vmem:[#allocation1] ss:$4 sm:$0xff] %v1145_v31  ;;  %v278_v51 = vadd.f32 %v207_v48, %v161_v46  ;;  %v911_v53 = vpop.eup %910 }
  0xb7   :  { %213 = vst [vmem:[#allocation1 + $0x1] ss:$4 sm:$0xff] %v1148_v33  ;;  %v329_v52 = vsel %vm328_vm1, %v312_v49, 0.0  ;;  %v313_v57 = vmul.f32 %v911_v53, %v1174_v44  ;;  %v150_v53 = vrot.slane %v1213_v22, 5 }
  0xb8   :  { %v211_v54 = vld.sshfl [vmem:[#allocation1 + $0x20] sm:$0xff pattern:$0x73625140]  ;;  %214 = vst [vmem:[#allocation1 + $0x2] ss:$4 sm:$0xff] %v1151_v34  ;;  %330 = vadd.xlane.f32.xlu0 %v329_v52  ;;  %912 = vtanh.f32 %v278_v51  ;;  %v149_v51 = vrot.slane %v1213_v22, 4 }
  0xb9   :  { %216 = vst [vmem:[#allocation1 + $0x20] ss:$4 sm:$0xff] %v1145_v31  ;;  %v279_v56 = vadd.f32 %v211_v54, %v162_v50  ;;  %v332_v63 = vsel %vm328_vm1, %v313_v57, 0.0  ;;  %v145_v54 = vrot.slane %v1156_v35, 7 }
  0xba   :  { %217 = vst [vmem:[#allocation1 + $0x21] ss:$4 sm:$0xff] %v1148_v33 }
  0xbb   :  { %218 = vst [vmem:[#allocation1 + $0x22] ss:$4 sm:$0xff] %v1151_v34  ;;  %914 = vtanh.f32 %v279_v56  ;;  %v171_v56 = vperm.slane %v149_v51, 0 }
  0xbe   :  { %v913_v60 = vpop.eup %912 }
  0xbf   :  { %v215_v61 = vld.sshfl [vmem:[#allocation1] sm:$0xff pattern:$0x73625140]  ;;  %v314_v62 = vmul.f32 %v913_v60, %v1174_v44 }
  0xc0   :  { %220 = vst [vmem:[#allocation1] ss:$4 sm:$0xff] %v1145_v31  ;;  %333 = vadd.xlane.f32.xlu0 %v332_v63  ;;  %v280_v1 = vadd.f32 %v215_v61, %v163_v59  ;;  %v172_v63 = vperm.slane %v150_v53, 0 }
  0xc1   :  { %v915_v2 = vpop.eup %914  ;;  %222 = vst [vmem:[#allocation1 + $0x2] ss:$4 sm:$0xff] %v1151_v34  ;;  %v335_v4 = vsel %vm328_vm1, %v314_v62, 0.0 }
  0xc2   :  { %v219_v7 = vld.sshfl [vmem:[#allocation1 + $0x20] sm:$0xff pattern:$0x73625140]  ;;  %221 = vst [vmem:[#allocation1 + $0x1] ss:$4 sm:$0xff] %v1148_v33  ;;  %336 = vadd.xlane.f32.xlu2 %v335_v4  ;;  %916 = vtanh.f32 %v280_v1  ;;  %v315_v10 = vmul.f32 %v915_v2, %v1174_v44 }
  0xc3   :  { %224 = vst [vmem:[#allocation1 + $0x20] ss:$4 sm:$0xff] %v1145_v31  ;;  %v281_v9 = vadd.f32 %v219_v7, %v164_v0  ;;  %v166_v0 = vperm.slane %v145_v54, 0 }
  0xc4   :  { %226 = vst [vmem:[#allocation1 + $0x22] ss:$4 sm:$0xff] %v1151_v34  ;;  %v338_v13 = vsel %vm328_vm1, %v315_v10, 0.0  ;;  %v173_v10 = vperm.slane %v151_v3, 0 }
  0xc5   :  { %225 = vst [vmem:[#allocation1 + $0x21] ss:$4 sm:$0xff] %v1148_v33  ;;  %918 = vtanh.f32 %v281_v9 }
  0xc8   :  { %v917_v14 = vpop.eup %916  ;;  %339 = vadd.xlane.f32.xlu0 %v338_v13 }
  0xc9   :  { %v223_v18 = vld.sshfl [vmem:[#allocation1] sm:$0xff pattern:$0x73625140]  ;;  %v316_v19 = vmul.f32 %v917_v14, %v1174_v44 }
  0xca   :  { %229 = vst [vmem:[#allocation1 + $0x1] ss:$4 sm:$0xff] %v1199_v11  ;;  %v282_v20 = vadd.f32 %v223_v18, %v165_v12 }
  0xcb   :  { %v919_v21 = vpop.eup %918  ;;  %228 = vst [vmem:[#allocation1] ss:$4 sm:$0xff] %v1207_v17  ;;  %v341_v23 = vsel %vm328_vm1, %v316_v19, 0.0 }
  0xcc   :  { %v1216_v24 = vld.sshfl [vmem:[#allocation1 + $0x20] sm:$0xff pattern:$0x73625140]  ;;  %230 = vst [vmem:[#allocation1 + $0x2] ss:$4 sm:$0xff] %v1204_v15  ;;  %v317_v25 = vmul.f32 %v919_v21, %v1174_v44  ;;  %342 = vadd.xlane.f32.xlu2 %v341_v23  ;;  %920 = vtanh.f32 %v282_v20 }
  0xcd   :  { %233 = vst [vmem:[#allocation1 + $0x21] ss:$4 sm:$0xff] %v1199_v11  ;;  %v283_v4 = vadd.f32 %v1216_v24, %v166_v0 }
  0xce   :  { %232 = vst [vmem:[#allocation1 + $0x20] ss:$4 sm:$0xff] %v1207_v17  ;;  %v344_v26 = vsel %vm328_vm1, %v317_v25, 0.0 }
  0xcf   :  { %234 = vst [vmem:[#allocation1 + $0x22] ss:$4 sm:$0xff] %v1204_v15  ;;  %345 = vadd.xlane.f32.xlu1 %v344_v26 }
  0xd2   :  { %v921_v29 = vpop.eup %920 }
  0xd3   :  { %v318_v30 = vmul.f32 %v921_v29, %v1174_v44  ;;  %v231_v31 = vld.sshfl [vmem:[#allocation1] sm:$0xff pattern:$0x73625140] }
  0xd4   :  { %v284_v33 = vadd.f32 %v231_v31, %v167_v28  ;;  %236 = vst [vmem:[#allocation1] ss:$4 sm:$0xff] %v1207_v17 }
  0xd5   :  { %v347_v34 = vsel %vm328_vm1, %v318_v30, 0.0  ;;  %237 = vst [vmem:[#allocation1 + $0x1] ss:$4 sm:$0xff] %v1199_v11 }
  0xd6   :  { %348 = vadd.xlane.f32.xlu0 %v347_v34  ;;  %922 = vtanh.f32 %v284_v33  ;;  %238 = vst [vmem:[#allocation1 + $0x2] ss:$4 sm:$0xff] %v1204_v15  ;;  %v235_v36 = vld.sshfl [vmem:[#allocation1 + $0x20] sm:$0xff pattern:$0x73625140] }
  0xd7   :  { %v285_v38 = vadd.f32 %v235_v36, %v168_v32  ;;  %240 = vst [vmem:[#allocation1 + $0x20] ss:$4 sm:$0xff] %v1207_v17 }
  0xd8   :  { %241 = vst [vmem:[#allocation1 + $0x21] ss:$4 sm:$0xff] %v1199_v11 }
  0xd9   :  { %242 = vst [vmem:[#allocation1 + $0x22] ss:$4 sm:$0xff] %v1204_v15  ;;  %924 = vtanh.f32 %v285_v38 }
  0xdc   :  { %v923_v41 = vpop.eup %922 }
  0xdd   :  { %v320_v42 = vmul.f32 %v923_v41, %v1174_v44  ;;  %v239_v43 = vld.sshfl [vmem:[#allocation1] sm:$0xff pattern:$0x73625140]  ;;  %v378_v41 = vstv %s1533_s7 }
  0xde   :  { %244 = vst [vmem:[#allocation1] ss:$4 sm:$0xff] %v1207_v17  ;;  %v286_v46 = vadd.f32 %v239_v43, %v169_v40  ;;  %v1277_v43 = vand.u32 127, %v411_v39 }
  0xdf   :  { %v353_v47 = vsel %vm328_vm1, %v320_v42, 0.0  ;;  %245 = vst [vmem:[#allocation1 + $0x1] ss:$4 sm:$0xff] %v1199_v11  ;;  %v925_v48 = vpop.eup %924 }
  0xe0   :  { %354 = vadd.xlane.f32.xlu1 %v353_v47  ;;  %246 = vst [vmem:[#allocation1 + $0x2] ss:$4 sm:$0xff] %v1204_v15  ;;  %926 = vtanh.f32 %v286_v46  ;;  %v243_v49 = vld.sshfl [vmem:[#allocation1 + $0x20] sm:$0xff pattern:$0x73625140]  ;;  %v321_v52 = vmul.f32 %v925_v48, %v1174_v44 }
  0xe1   :  { %248 = vst [vmem:[#allocation1 + $0x20] ss:$4 sm:$0xff] %v1207_v17  ;;  %v287_v50 = vadd.f32 %v243_v49, %v170_v45 }
  0xe2   :  { %249 = vst [vmem:[#allocation1 + $0x21] ss:$4 sm:$0xff] %v1199_v11  ;;  %v356_v57 = vsel %vm328_vm1, %v321_v52, 0.0 }
  0xe3   :  { %250 = vst [vmem:[#allocation1 + $0x22] ss:$4 sm:$0xff] %v1204_v15  ;;  %928 = vtanh.f32 %v287_v50 }
  0xe6   :  { %v927_v55 = vpop.eup %926 }
  0xe7   :  { %v322_v58 = vmul.f32 %v927_v55, %v1174_v44  ;;  %v247_v59 = vld.sshfl [vmem:[#allocation1] sm:$0xff pattern:$0x73625140] }
  0xe8   :  { %357 = vadd.xlane.f32.xlu1 %v356_v57  ;;  %252 = vst [vmem:[#allocation1] ss:$4 sm:$0xff] %v1207_v17  ;;  %v288_v60 = vadd.f32 %v247_v59, %v171_v56 }
  0xe9   :  { %v929_v61 = vpop.eup %928  ;;  %v359_v62 = vsel %vm328_vm1, %v322_v58, 0.0  ;;  %253 = vst [vmem:[#allocation1 + $0x1] ss:$4 sm:$0xff] %v1199_v11 }
  0xea   :  { %360 = vadd.xlane.f32.xlu2 %v359_v62  ;;  %v251_v35 = vld.sshfl [vmem:[#allocation1 + $0x20] sm:$0xff pattern:$0x73625140]  ;;  %254 = vst [vmem:[#allocation1 + $0x2] ss:$4 sm:$0xff] %v1204_v15  ;;  %930 = vtanh.f32 %v288_v60  ;;  %v323_v1 = vmul.f32 %v929_v61, %v1174_v44 }
  0xeb   :  { %256 = vst [vmem:[#allocation1 + $0x20] ss:$4 sm:$0xff] %v1207_v17  ;;  %v289_v2 = vadd.f32 %v251_v35, %v172_v63  ;;  %v174_v17 = vperm.slane %v152_v8, 0 }
  0xec   :  { %257 = vst [vmem:[#allocation1 + $0x21] ss:$4 sm:$0xff] %v1199_v11  ;;  %v362_v7 = vsel %vm328_vm1, %v323_v1, 0.0 }
  0xed   :  { %258 = vst [vmem:[#allocation1 + $0x22] ss:$4 sm:$0xff] %v1204_v15  ;;  %932 = vtanh.f32 %v289_v2 }
  0xee   :  { %934 = vtanh.f32 %v283_v4 }
  0xf0   :  { %v931_v9 = vpop.eup %930  ;;  %363 = vadd.xlane.f32.xlu1 %v362_v7 }
  0xf1   :  { %v324_v12 = vmul.f32 %v931_v9, %v1174_v44  ;;  %v255_v13 = vld.sshfl [vmem:[#allocation1] sm:$0xff pattern:$0x73625140] }
  0xf2   :  { %v290_v14 = vadd.f32 %v255_v13, %v173_v10 }
  0xf3   :  { %v933_v11 = vpop.eup %932  ;;  %v365_v16 = vsel %vm328_vm1, %v324_v12, 0.0 }
  0xf4   :  { %v325_v15 = vmul.f32 %v933_v11, %v1174_v44  ;;  %366 = vadd.xlane.f32.xlu0 %v365_v16  ;;  %936 = vtanh.f32 %v290_v14  ;;  %v259_v18 = vld.sshfl [vmem:[#allocation1 + $0x20] sm:$0xff pattern:$0x73625140]  ;;  %v935_v21 = vpop.eup %934 }
  0xf5   :  { %v291_v19 = vadd.f32 %v259_v18, %v174_v17  ;;  %v319_v23 = vmul.f32 %v935_v21, %v1174_v44 }
  0xf6   :  { %v368_v20 = vsel %vm328_vm1, %v325_v15, 0.0 }
  0xf7   :  { %369 = vadd.xlane.f32.xlu2 %v368_v20  ;;  %938 = vtanh.f32 %v291_v19  ;;  %v350_v27 = vsel %vm328_vm1, %v319_v23, 0.0 }
  0xfa   :  { %v937_v22 = vpop.eup %936 }
  0xfb   :  { %v326_v24 = vmul.f32 %v937_v22, %v1174_v44 }
  0xfd   :  { %v939_v25 = vpop.eup %938  ;;  %v371_v26 = vsel %vm328_vm1, %v326_v24, 0.0 }
  0xfe   :  { %372 = vadd.xlane.f32.xlu1 %v371_v26  ;;  %v327_v28 = vmul.f32 %v939_v25, %v1174_v44 }
  0xff   :  { %351 = vadd.xlane.f32.xlu2 %v350_v27 }
 0x100   :  { %v374_v29 = vsel %vm328_vm1, %v327_v28, 0.0 }
 0x101   :  { %375 = vadd.xlane.f32.xlu0 %v374_v29 }
 0x12b   :  { %v331_v30 = vpop.xlane.xlu0 %330 }
 0x12c   :  { %v1279_v45 = vadd.f32 %v378_v41, %v331_v30 }
 0x12e   :  { %v413_v53 = vperm.slane %v1279_v45, %v1277_v43 }
 0x133   :  { %v334_v31 = vpop.xlane.xlu0 %333 }
 0x134   :  { %v1275_v44 = vadd.f32 %v378_v41, %v334_v31 }
 0x135   :  { %v337_v33 = vpop.xlane.xlu2 %336 }
 0x136   :  { %v1283_v47 = vadd.f32 %v378_v41, %v337_v33  ;;  %v414_v49 = vperm.slane %v1275_v44, %v1277_v43 }
 0x138   :  { %v415_v57 = vperm.slane %v1283_v47, %v1277_v43  ;;  %v430_v58 = vsel %vm429_vm2, %v414_v49, %v413_v53 }
 0x13a   :  { %v432_v2 = vsel %vm431_vm3, %v415_v57, %v430_v58 }
 0x13b   :  { %v340_v36 = vpop.xlane.xlu0 %339 }
 0x13c   :  { %v1287_v50 = vadd.f32 %v378_v41, %v340_v36  ;;  %v1002_v36 = vmov 0  }
 0x13d   :  { %904 = vset.pattern.permute.xlu2 %v1002_v36  ;;  %903 = vset.pattern.permute.xlu1 %v1002_v36 }
 0x13e   :  { %v416_v60 = vperm.slane %v1287_v50, %v1277_v43  ;;  %902 = vset.pattern.permute.xlu0 %v1002_v36 }
 0x13f   :  { %v343_v37 = vpop.xlane.xlu2 %342 }
 0x140   :  { %v383_v59 = vadd.f32 %v378_v41, %v343_v37  ;;  %v434_v4 = vsel %vm433_vm4, %v416_v60, %v432_v2 }
 0x142   :  { %v346_v32 = vpop.xlane.xlu1 %345  ;;  %v417_v3 = vperm.slane %v383_v59, %v1277_v43 }
 0x143   :  { %v384_v7 = vadd.f32 %v378_v41, %v346_v32 }
 0x144   :  { %v436_v11 = vsel %vm435_vm5, %v417_v3, %v434_v4 }
 0x145   :  { %v418_v16 = vperm.slane %v384_v7, %v1277_v43 }
 0x147   :  { %v438_v24 = vsel %vm437_vm6, %v418_v16, %v436_v11 }
 0x149   :  { %v349_v40 = vpop.xlane.xlu0 %348 }
 0x14a   :  { %v1316_v8 = vadd.f32 %v378_v41, %v349_v40 }
 0x14c   :  { %v419_v17 = vperm.slane %v1316_v8, %v1277_v43 }
 0x14e   :  { %v440_v28 = vsel %vm439_vm7, %v419_v17, %v438_v24 }
 0x153   :  { %v355_v34 = vpop.xlane.xlu1 %354 }
 0x154   :  { %v1289_v51 = vadd.f32 %v378_v41, %v355_v34 }
 0x156   :  { %v421_v61 = vperm.slane %v1289_v51, %v1277_v43 }
 0x15b   :  { %v358_v38 = vpop.xlane.xlu1 %357 }
 0x15c   :  { %v1281_v46 = vadd.f32 %v378_v41, %v358_v38 }
 0x15d   :  { %v361_v42 = vpop.xlane.xlu2 %360 }
 0x15e   :  { %v1291_v52 = vadd.f32 %v378_v41, %v361_v42  ;;  %v422_v54 = vperm.slane %v1281_v46, %v1277_v43 }
 0x160   :  { %v423_v62 = vperm.slane %v1291_v52, %v1277_v43  ;;  %v443_v35 = vsel %vm429_vm2, %v422_v54, %v421_v61 }
 0x162   :  { %v444_v9 = vsel %vm431_vm3, %v423_v62, %v443_v35 }
 0x163   :  { %v364_v48 = vpop.xlane.xlu1 %363 }
 0x164   :  { %v1297_v55 = vadd.f32 %v378_v41, %v364_v48 }
 0x166   :  { %v424_v1 = vperm.slane %v1297_v55, %v1277_v43 }
 0x167   :  { %v367_v56 = vpop.xlane.xlu0 %366 }
 0x168   :  { %v1308_v0 = vadd.f32 %v378_v41, %v367_v56  ;;  %v445_v12 = vsel %vm433_vm4, %v424_v1, %v444_v9 }
 0x16a   :  { %v370_v63 = vpop.xlane.xlu2 %369  ;;  %v425_v10 = vperm.slane %v1308_v0, %v1277_v43 }
 0x16b   :  { %v1322_v13 = vadd.f32 %v378_v41, %v370_v63 }
 0x16c   :  { %v446_v15 = vsel %vm435_vm5, %v425_v10, %v445_v12 }
 0x16d   :  { %v426_v20 = vperm.slane %v1322_v13, %v1277_v43 }
 0x16f   :  { %v447_v27 = vsel %vm437_vm6, %v426_v20, %v446_v15 }
 0x171   :  { %v373_v14 = vpop.xlane.xlu1 %372 }
 0x172   :  { %v1329_v18 = vadd.f32 %v378_v41, %v373_v14  ;;  %v352_v19 = vpop.xlane.xlu2 %351 }
 0x173   :  { %v1333_v21 = vadd.f32 %v378_v41, %v352_v19 }
 0x174   :  { %v427_v22 = vperm.slane %v1329_v18, %v1277_v43  ;;  %v376_v23 = vpop.xlane.xlu0 %375 }
 0x175   :  { %v420_v25 = vperm.slane %v1333_v21, %v1277_v43  ;;  %v1340_v26 = vadd.f32 %v378_v41, %v376_v23 }
 0x176   :  { %v448_v29 = vsel %vm439_vm7, %v427_v22, %v447_v27 }
 0x177   :  { %v428_v30 = vperm.slane %v1340_v26, %v1277_v43  ;;  %v442_v31 = vsel %vm441_vm8, %v420_v25, %v440_v28 }
 0x178   :  { %v453_v32 = vsel %vm452_vm9, %v442_v31, -inf }
 0x179   :  { %454 = vmax.xlane.f32.xlu1 %v453_v32  ;;  %v449_v33 = vsel %vm441_vm8, %v428_v30, %v448_v29 }
 0x17a   :  { %v456_v34 = vsel %vm452_vm9, %v449_v33, -inf }
 0x17b   :  { %457 = vmax.xlane.f32.xlu2 %v456_v34 }
 0x1ec   :  { %v1351_v37 = vpop.xlane.xlu1 %454 }
 0x1ed   :  { %v462_v38 = vperm.slane %v1351_v37, 1  ;;  %v461_v39 = vperm.slane %v1351_v37, 0  ;;  %v465_v40 = vperm.slane %v1351_v37, 4  ;;  %v463_v53 = vperm.slane %v1351_v37, 2 }
 0x1ee   :  { %v1356_v41 = vpop.xlane.xlu2 %457  ;;  %v466_v54 = vperm.slane %v1351_v37, 5  ;;  %v467_v12 = vperm.slane %v1351_v37, 6  ;;  %v468_v34 = vperm.slane %v1351_v37, 7 }
 0x1ef   :  { %v494_v42 = vsub.f32 %v1275_v44, %v462_v38  ;;  %v493_v48 = vsub.f32 %v1279_v45, %v461_v39  ;;  %v497_v49 = vsub.f32 %v383_v59, %v465_v40  ;;  %v469_v56 = vperm.slane %v1356_v41, 0 }
 0x1f0   :  { %v495_v61 = vsub.f32 %v1283_v47, %v463_v53  ;;  %v498_v62 = vsub.f32 %v384_v7, %v466_v54  ;;  %v464_v45 = vperm.slane %v1351_v37, 3  ;;  %v472_v35 = vperm.slane %v1356_v41, 3 }
 0x1f1   :  { %v511_v57 = vmul.f32 1.442695, %v494_v42  ;;  %v509_v58 = vmul.f32 1.442695, %v493_v48  ;;  %v517_v60 = vmul.f32 1.442695, %v497_v49  ;;  %v501_v44 = vsub.f32 %v1289_v51, %v469_v56 }
 0x1f2   :  { %v513_v63 = vmul.f32 1.442695, %v495_v61  ;;  %v519_v59 = vmul.f32 1.442695, %v498_v62  ;;  %v470_v3 = vperm.slane %v1356_v41, 1  ;;  %v496_v51 = vsub.f32 %v1287_v50, %v464_v45 }
 0x1f3   :  { %940 = vpow2.f32 %v511_v57  ;;  %v525_v2 = vmul.f32 1.442695, %v501_v44  ;;  %v504_v7 = vsub.f32 %v1297_v55, %v472_v35  ;;  %v475_v11 = vperm.slane %v1356_v41, 6 }
 0x1f4   :  { %942 = vpow2.f32 %v509_v58  ;;  %v502_v9 = vsub.f32 %v1281_v46, %v470_v3  ;;  %v515_v10 = vmul.f32 1.442695, %v496_v51  ;;  %v471_v15 = vperm.slane %v1356_v41, 2 }
 0x1f5   :  { %944 = vpow2.f32 %v517_v60  ;;  %v531_v14 = vmul.f32 1.442695, %v504_v7  ;;  %v499_v46 = vsub.f32 %v1316_v8, %v467_v12  ;;  %v507_v55 = vsub.f32 %v1329_v18, %v475_v11 }
 0x1f6   :  { %946 = vpow2.f32 %v513_v63  ;;  %v527_v17 = vmul.f32 1.442695, %v502_v9  ;;  %v503_v20 = vsub.f32 %v1291_v52, %v471_v15  ;;  %v473_v23 = vperm.slane %v1356_v41, 4 }
 0x1f7   :  { %948 = vpow2.f32 %v519_v59  ;;  %v521_v22 = vmul.f32 1.442695, %v499_v46  ;;  %v537_v24 = vmul.f32 1.442695, %v507_v55  ;;  %v474_v28 = vperm.slane %v1356_v41, 5 }
 0x1f8   :  { %950 = vpow2.f32 %v525_v2  ;;  %v529_v27 = vmul.f32 1.442695, %v503_v20  ;;  %v505_v52 = vsub.f32 %v1308_v0, %v473_v23  ;;  %v476_v31 = vperm.slane %v1356_v41, 7 }
 0x1f9   :  { %v1367_v1 = vpop.eup %940  ;;  %952 = vpow2.f32 %v515_v10  ;;  %v506_v18 = vsub.f32 %v1322_v13, %v474_v28  ;;  %v500_v13 = vsub.f32 %v1333_v21, %v468_v34 }
 0x1fa   :  { %v1370_v4 = vpop.eup %942  ;;  %561 = vperm.xlu1 %903, %v1367_v1   ;;  %954 = vpow2.f32 %v531_v14  ;;  %v533_v30 = vmul.f32 1.442695, %v505_v52  ;;  %v508_v0 = vsub.f32 %v1340_v26, %v476_v31 }
 0x1fb   :  { %v1373_v47 = vpop.eup %944  ;;  %558 = vperm.xlu0 %902, %v1370_v4   ;;  %956 = vpow2.f32 %v527_v17  ;;  %v535_v33 = vmul.f32 1.442695, %v506_v18  ;;  %v523_v37 = vmul.f32 1.442695, %v500_v13 }
 0x1fc   :  { %570 = vperm.xlu2 %904, %v1373_v47   ;;  %v1382_v16 = vpop.eup %946  ;;  %958 = vpow2.f32 %v521_v22  ;;  %v539_v39 = vmul.f32 1.442695, %v508_v0 }
 0x1fd   :  { %v1385_v50 = vpop.eup %948  ;;  %960 = vpow2.f32 %v537_v24 }
 0x1fe   :  { %v1388_v19 = vpop.eup %950  ;;  %962 = vpow2.f32 %v529_v27 }
 0x1ff   :  { %v1396_v25 = vpop.eup %952  ;;  %964 = vpow2.f32 %v533_v30 }
 0x200   :  { %v1399_v29 = vpop.eup %954  ;;  %966 = vpow2.f32 %v535_v33 }
 0x201   :  { %v1402_v8 = vpop.eup %956  ;;  %968 = vpow2.f32 %v539_v39 }
 0x202   :  { %564 = vperm.xlu1 %903, %v1382_v16   ;;  %v1409_v32 = vpop.eup %958  ;;  %970 = vpow2.f32 %v523_v37 }
 0x203   :  { %573 = vperm.xlu0 %902, %v1385_v50   ;;  %v1412_v36 = vpop.eup %960 }
 0x204   :  { %582 = vperm.xlu2 %904, %v1388_v19   ;;  %v1415_v38 = vpop.eup %962 }
 0x205   :  { %v1421_v40 = vpop.eup %964 }
 0x206   :  { %v1424_v41 = vpop.eup %966 }
 0x207   :  { %v1427_v42 = vpop.eup %968 }
 0x208   :  { %v1430_v26 = vpop.eup %970 }
 0x20a   :  { %567 = vperm.xlu1 %903, %v1396_v25  }
 0x20b   :  { %591 = vperm.xlu0 %902, %v1399_v29  }
 0x20c   :  { %585 = vperm.xlu2 %904, %v1402_v8  }
 0x212   :  { %576 = vperm.xlu1 %903, %v1409_v32  }
 0x213   :  { %600 = vperm.xlu0 %902, %v1412_v36  }
 0x214   :  { %588 = vperm.xlu2 %904, %v1415_v38  }
 0x21a   :  { %594 = vperm.xlu1 %903, %v1421_v40  }
 0x21c   :  { %597 = vperm.xlu2 %904, %v1424_v41  }
 0x222   :  { %603 = vperm.xlu1 %903, %v1427_v42  }
 0x224   :  { %579 = vperm.xlu2 %904, %v1430_v26  }
 0x256   :  { %v571_v21 = vpop.permute.xlu2 %570 }
 0x257   :  { %v609_v3 = vperm.slane %v571_v21, %v1277_v43 }
 0x25e   :  { %v583_v48 = vpop.permute.xlu2 %582 }
 0x25f   :  { %v613_v23 = vperm.slane %v583_v48, %v1277_v43 }
 0x266   :  { %v586_v49 = vpop.permute.xlu2 %585 }
 0x267   :  { %v614_v55 = vperm.slane %v586_v49, %v1277_v43 }
 0x269   :  { %v628_v28 = vsel %vm429_vm2, %v614_v55, %v613_v23 }
 0x26c   :  { %v562_v53 = vpop.permute.xlu1 %561 }
 0x26d   :  { %v559_v56 = vpop.permute.xlu0 %558  ;;  %v606_v60 = vperm.slane %v562_v53, %v1277_v43 }
 0x26e   :  { %v589_v54 = vpop.permute.xlu2 %588  ;;  %v605_v61 = vperm.slane %v559_v56, %v1277_v43 }
 0x26f   :  { %v615_v22 = vperm.slane %v589_v54, %v1277_v43 }
 0x270   :  { %v621_v59 = vsel %vm429_vm2, %v606_v60, %v605_v61 }
 0x271   :  { %v629_v18 = vsel %vm431_vm3, %v615_v22, %v628_v28 }
 0x274   :  { %v565_v57 = vpop.permute.xlu1 %564 }
 0x275   :  { %v607_v62 = vperm.slane %v565_v57, %v1277_v43  ;;  %v574_v63 = vpop.permute.xlu0 %573 }
 0x276   :  { %v598_v58 = vpop.permute.xlu2 %597  ;;  %v610_v9 = vperm.slane %v574_v63, %v1277_v43 }
 0x277   :  { %v622_v35 = vsel %vm431_vm3, %v607_v62, %v621_v59  ;;  %v618_v33 = vperm.slane %v598_v58, %v1277_v43 }
 0x27c   :  { %v568_v44 = vpop.permute.xlu1 %567 }
 0x27d   :  { %v608_v45 = vperm.slane %v568_v44, %v1277_v43  ;;  %v592_v17 = vpop.permute.xlu0 %591 }
 0x27e   :  { %v580_v7 = vpop.permute.xlu2 %579  ;;  %v616_v24 = vperm.slane %v592_v17, %v1277_v43 }
 0x27f   :  { %v623_v2 = vsel %vm433_vm4, %v608_v45, %v622_v35  ;;  %v612_v14 = vperm.slane %v580_v7, %v1277_v43 }
 0x280   :  { %v624_v51 = vsel %vm435_vm5, %v609_v3, %v623_v2  ;;  %v630_v30 = vsel %vm433_vm4, %v616_v24, %v629_v18 }
 0x281   :  { %v625_v11 = vsel %vm437_vm6, %v610_v9, %v624_v51 }
 0x284   :  { %v577_v10 = vpop.permute.xlu1 %576 }
 0x285   :  { %v611_v12 = vperm.slane %v577_v10, %v1277_v43  ;;  %v601_v34 = vpop.permute.xlu0 %600 }
 0x286   :  { %v619_v13 = vperm.slane %v601_v34, %v1277_v43 }
 0x287   :  { %v626_v15 = vsel %vm439_vm7, %v611_v12, %v625_v11 }
 0x288   :  { %v627_v46 = vsel %vm441_vm8, %v612_v14, %v626_v15 }
 0x289   :  { %v637_v20 = vsel %vm452_vm9, %v627_v46, 0.0 }
 0x28a   :  { %638 = vadd.xlane.f32.xlu0 %v637_v20 }
 0x28c   :  { %v595_v27 = vpop.permute.xlu1 %594 }
 0x28d   :  { %v617_v52 = vperm.slane %v595_v27, %v1277_v43 }
 0x28f   :  { %v631_v31 = vsel %vm435_vm5, %v617_v52, %v630_v30 }
 0x290   :  { %v632_v0 = vsel %vm437_vm6, %v618_v33, %v631_v31 }
 0x291   :  { %v633_v21 = vsel %vm439_vm7, %v619_v13, %v632_v0 }
 0x294   :  { %v604_v39 = vpop.permute.xlu1 %603 }
 0x295   :  { %v620_v37 = vperm.slane %v604_v39, %v1277_v43 }
 0x297   :  { %v634_v48 = vsel %vm441_vm8, %v620_v37, %v633_v21 }
 0x298   :  { %v640_v49 = vsel %vm452_vm9, %v634_v48, 0.0 }
 0x299   :  { %641 = vadd.xlane.f32.xlu2 %v640_v49 }
 0x2fd   :  { %v639_v53 = vpop.xlane.xlu0 %638 }
 0x2fe   :  { %972 = vrcp.f32 %v639_v53  ;;  %v654_v58 = vand.u32 2147483648, %v639_v53  ;;  %v652_v61 = vand.u32 2147483647, %v639_v53  ;;  %vm648_vm11 = vweird.f32 %v639_v53 }
 0x300   :  { %v655_v44 = vor.u32 1.1754944e-38, %v654_v58  ;;  %vm653_vm13 = vcmp.eq.f32.partialorder %v652_v61, 8.507059e+37 }
 0x304   :  { %v973_v54 = vpop.eup %972 }
 0x305   :  { %v644_v56 = vmul.f32 %v973_v54, %v639_v53  ;;  %vm649_vm10 = vweird.f32 %v973_v54 }
 0x306   :  { %vm650_vm12 = vmor %vm648_vm11, %vm649_vm10  ;;  %vm770_vm10 = vcmask 1045504  }
 0x307   :  { %v645_v57 = vsub.f32 1.0, %v644_v56  ;;  %896 = vmatpush.msk.msra.mxu3 %vm770_vm10, %v1079_v6  ;;  %894 = vmatpush.msk.msra.mxu2 %vm770_vm10, %v1074_v5 }
 0x309   :  { %v646_v60 = vmul.f32 %v973_v54, %v645_v57 }
 0x30b   :  { %v647_v62 = vadd.f32 %v973_v54, %v646_v60 }
 0x30c   :  { %v642_v63 = vpop.xlane.xlu2 %641 }
 0x30d   :  { %v651_v45 = vsel %vm650_vm12, %v973_v54, %v647_v62  ;;  %974 = vrcp.f32 %v642_v63  ;;  %v668_v15 = vand.u32 2147483648, %v642_v63  ;;  %v666_v55 = vand.u32 2147483647, %v642_v63 }
 0x30e   :  { %v656_v59 = vsel %vm653_vm13, %v655_v44, %v651_v45  ;;  %vm662_vm15 = vweird.f32 %v642_v63 }
 0x30f   :  { %v678_v35 = vperm.slane %v656_v59, 5  ;;  %v676_v2 = vperm.slane %v656_v59, 3  ;;  %v673_v3 = vperm.slane %v656_v59, 0  ;;  %v679_v14 = vperm.slane %v656_v59, 6 }
 0x310   :  { %v674_v17 = vperm.slane %v656_v59, 1  ;;  %vm667_vm1 = vcmp.eq.f32.partialorder %v666_v55, 8.507059e+37  ;;  %v675_v28 = vperm.slane %v656_v59, 2  ;;  %v677_v30 = vperm.slane %v656_v59, 4 }
 0x311   :  { %v710_v51 = vmul.f32 %v1385_v50, %v678_v35  ;;  %v708_v7 = vmul.f32 %v1396_v25, %v676_v2  ;;  %v705_v9 = vmul.f32 %v1370_v4, %v673_v3  ;;  %v711_v20 = vmul.f32 %v1409_v32, %v679_v14 }
 0x312   :  { %v706_v50 = vmul.f32 %v1367_v1, %v674_v17  ;;  %v669_v4 = vor.u32 1.1754944e-38, %v668_v15  ;;  %v707_v32 = vmul.f32 %v1382_v16, %v675_v28  ;;  %v709_v33 = vmul.f32 %v1373_v47, %v677_v30 }
 0x313   :  { %v975_v10 = vpop.eup %974  ;;  %745 = vperm.xlu0 %902, %v710_v51   ;;  %739 = vperm.xlu2 %904, %v708_v7   ;;  %v680_v21 = vperm.slane %v656_v59, 7 }
 0x314   :  { %v658_v12 = vmul.f32 %v975_v10, %v642_v63  ;;  %730 = vperm.xlu1 %903, %v705_v9   ;;  %vm663_vm14 = vweird.f32 %v975_v10 }
 0x315   :  { %vm664_vm0 = vmor %vm662_vm15, %vm663_vm14 }
 0x316   :  { %v659_v11 = vsub.f32 1.0, %v658_v12 }
 0x318   :  { %v660_v46 = vmul.f32 %v975_v10, %v659_v11 }
 0x31a   :  { %v661_v22 = vadd.f32 %v975_v10, %v660_v46 }
 0x31b   :  { %748 = vperm.xlu2 %904, %v711_v20  }
 0x31c   :  { %v665_v25 = vsel %vm664_vm0, %v975_v10, %v661_v22  ;;  %733 = vperm.xlu1 %903, %v706_v50  }
 0x31d   :  { %v670_v23 = vsel %vm667_vm1, %v669_v4, %v665_v25 }
 0x31e   :  { %v684_v24 = vperm.slane %v670_v23, 3  ;;  %v688_v27 = vperm.slane %v670_v23, 7  ;;  %v687_v1 = vperm.slane %v670_v23, 6  ;;  %v681_v34 = vperm.slane %v670_v23, 0 }
 0x31f   :  { %v683_v13 = vperm.slane %v670_v23, 2  ;;  %v685_v39 = vperm.slane %v670_v23, 4 }
 0x320   :  { %v716_v52 = vmul.f32 %v1399_v29, %v684_v24  ;;  %v720_v18 = vmul.f32 %v1427_v42, %v688_v27  ;;  %v719_v31 = vmul.f32 %v1412_v36, %v687_v1  ;;  %v713_v0 = vmul.f32 %v1388_v19, %v681_v34 }
 0x321   :  { %v682_v29 = vperm.slane %v670_v23, 1  ;;  %v715_v16 = vmul.f32 %v1415_v38, %v683_v13  ;;  %v717_v37 = vmul.f32 %v1421_v40, %v685_v39  ;;  %v686_v36 = vperm.slane %v670_v23, 5 }
 0x322   :  { %811 = vperm.xlu0 %902, %v716_v52   ;;  %v712_v19 = vmul.f32 %v1430_v26, %v680_v21 }
 0x323   :  { %823 = vperm.xlu2 %904, %v720_v18   ;;  %v714_v42 = vmul.f32 %v1402_v8, %v682_v29  ;;  %v718_v47 = vmul.f32 %v1424_v41, %v686_v36 }
 0x324   :  { %736 = vperm.xlu1 %903, %v707_v32  }
 0x32a   :  { %820 = vperm.xlu0 %902, %v719_v31  }
 0x32c   :  { %742 = vperm.xlu1 %903, %v709_v33  }
 0x334   :  { %802 = vperm.xlu1 %903, %v713_v0  }
 0x33c   :  { %805 = vperm.xlu1 %903, %v714_v42  }
 0x344   :  { %808 = vperm.xlu1 %903, %v715_v16  }
 0x34c   :  { %814 = vperm.xlu1 %903, %v717_v37  }
 0x354   :  { %817 = vperm.xlu1 %903, %v718_v47  }
 0x35c   :  { %751 = vperm.xlu1 %903, %v712_v19  }
 0x36d   :  { %v740_v40 = vpop.permute.xlu2 %739 }
 0x36e   :  { %v756_v12 = vperm.slane %v740_v40, %v1277_v43 }
 0x375   :  { %v749_v58 = vpop.permute.xlu2 %748 }
 0x376   :  { %v759_v24 = vperm.slane %v749_v58, %v1277_v43 }
 0x37d   :  { %v824_v51 = vpop.permute.xlu2 %823 }
 0x37e   :  { %v832_v46 = vperm.slane %v824_v51, %v1277_v43 }
 0x385   :  { %v746_v56 = vpop.permute.xlu0 %745 }
 0x386   :  { %v731_v48 = vpop.permute.xlu1 %730  ;;  %v758_v4 = vperm.slane %v746_v56, %v1277_v43 }
 0x387   :  { %v753_v6 = vperm.slane %v731_v48, %v1277_v43 }
 0x38e   :  { %v734_v49 = vpop.permute.xlu1 %733 }
 0x38f   :  { %v754_v62 = vperm.slane %v734_v49, %v1277_v43 }
 0x391   :  { %v761_v35 = vsel %vm429_vm2, %v754_v62, %v753_v6 }
 0x394   :  { %v812_v41 = vpop.permute.xlu0 %811 }
 0x395   :  { %v828_v2 = vperm.slane %v812_v41, %v1277_v43 }
 0x396   :  { %v737_v8 = vpop.permute.xlu1 %736 }
 0x397   :  { %v755_v63 = vperm.slane %v737_v8, %v1277_v43 }
 0x399   :  { %v762_v7 = vsel %vm431_vm3, %v755_v63, %v761_v35 }
 0x39a   :  { %v763_v55 = vsel %vm433_vm4, %v756_v12, %v762_v7 }
 0x39c   :  { %v821_v3 = vpop.permute.xlu0 %820 }
 0x39d   :  { %v831_v17 = vperm.slane %v821_v3, %v1277_v43 }
 0x39e   :  { %v743_v53 = vpop.permute.xlu1 %742 }
 0x39f   :  { %v757_v9 = vperm.slane %v743_v53, %v1277_v43 }
 0x3a1   :  { %v764_v22 = vsel %vm435_vm5, %v757_v9, %v763_v55 }
 0x3a2   :  { %v765_v23 = vsel %vm437_vm6, %v758_v4, %v764_v22 }
 0x3a3   :  { %v766_v52 = vsel %vm439_vm7, %v759_v24, %v765_v23 }
 0x3a6   :  { %v803_v54 = vpop.permute.xlu1 %802 }
 0x3a7   :  { %v825_v44 = vperm.slane %v803_v54, %v1277_v43 }
 0x3ae   :  { %v806_v38 = vpop.permute.xlu1 %805 }
 0x3af   :  { %v826_v26 = vperm.slane %v806_v38, %v1277_v43 }
 0x3b1   :  { %v833_v5 = vsel %vm429_vm2, %v826_v26, %v825_v44 }
 0x3b6   :  { %v809_v57 = vpop.permute.xlu1 %808 }
 0x3b7   :  { %v827_v61 = vperm.slane %v809_v57, %v1277_v43 }
 0x3b9   :  { %v834_v45 = vsel %vm431_vm3, %v827_v61, %v833_v5 }
 0x3ba   :  { %v835_v14 = vsel %vm433_vm4, %v828_v2, %v834_v45 }
 0x3be   :  { %v815_v60 = vpop.permute.xlu1 %814 }
 0x3bf   :  { %v829_v59 = vperm.slane %v815_v60, %v1277_v43 }
 0x3c1   :  { %v836_v15 = vsel %vm435_vm5, %v829_v59, %v835_v14 }
 0x3c6   :  { %v818_v10 = vpop.permute.xlu1 %817 }
 0x3c7   :  { %v830_v11 = vperm.slane %v818_v10, %v1277_v43 }
 0x3c9   :  { %v837_v20 = vsel %vm437_vm6, %v830_v11, %v836_v15 }
 0x3ca   :  { %v838_v50 = vsel %vm439_vm7, %v831_v17, %v837_v20 }
 0x3cb   :  { %v839_v25 = vsel %vm441_vm8, %v832_v46, %v838_v50 }
 0x3cc   :  { %897 = vmatmul.msk.f32.vlgmr.msra.gmra.mxu3 %vm452_vm9, %v839_v25  ;;  %869 = vst.msk [vmem:[%s1535_s9 + $0x8] sm:$0xff] %vm452_vm9, %v839_v25 }
 0x3ce   :  { %v752_v27 = vpop.permute.xlu1 %751 }
 0x3cf   :  { %v760_v28 = vperm.slane %v752_v27, %v1277_v43 }
 0x3d1   :  { %v767_v18 = vsel %vm441_vm8, %v760_v28, %v766_v52 }
 0x3d2   :  { %895 = vmatmul.msk.f32.vlgmr.msra.gmra.mxu2 %vm452_vm9, %v767_v18  ;;  %868 = vst.msk [vmem:[%s1535_s9] sm:$0xff] %vm452_vm9, %v767_v18 }
 0x44f   :  { %v861_v32 = vpop.f32.mrf.mxu3 }
 0x450   :  { %865 = vst [vmem:[#allocation3 + $0x8] sm:$0xff] %v861_v32 }
 0x455   :  { %v790_v43 = vpop.f32.mrf.mxu2 }
 0x456   :  { %864 = vst [vmem:[#allocation3] sm:$0xff] %v790_v43 }
 0x457   :  { %882 = dma.vmem_to_hbm [thread:$0]  %s875_s14, 256, %s877_s17, [#allocation4], %s1004_s18, %s1004_s18, %s1005_s19  }
 0x458   :  { %1000 = dma.done.wait [#allocation4], 256  }
 0x459   :  { %1001 = vsyncadd [#allocation4], 4294967040 }
 0x45a   :  { %891 = vsyncpa [#allocation4], 1 }

</bundles_post_ra>
